<compile_context>
chip_gen: v6e
topology: v6e:2x2x1
jax: 0.10.0
libtpu: 0.0.40
codegen_flags: <defaults>
</compile_context>

<pallas_src>
import functools

import jax
import jax.numpy as jnp
from jax.experimental import pallas as pl
from jax.experimental.pallas import tpu as pltpu


def _round_up(x, m):
    return (x + m - 1) // m * m


def _choose_nk_tiles(K, N):
    """Pick (tk, tn) and tile-aligned padded dims (Kp, Np). Batch-independent."""
    Kp128 = _round_up(K, 128)
    Np128 = _round_up(N, 128)
    tk = min(1024, Kp128)
    tn = min(512, Np128)
    # v7x has 2 TensorCores; keep >=2 N-blocks when N is large enough so both
    # cores get work even when the whole batch fits in a single M-block.
    if Np128 >= 256 and Np128 // tn < 2:
        tn = _round_up(Np128 // 2, 128)
    # Pad dims up to tile multiples so the grid's floor division is exact.
    Kp = _round_up(Kp128, tk)
    Np = _round_up(Np128, tn)
    return tk, tn, Kp, Np


# ---------------------------------------------------------------------------
# Tiled linear kernel:  o = [relu]( x @ W + b )
#   x: (tm, tk) bf16   W: (tk, tn) bf16 (pre-transposed)   b: (1, tn) f32
#   grid = (Mp/tm, Np/tn, Kp/tk), K is the last ("arbitrary") axis.
# ---------------------------------------------------------------------------
def _linear_kernel(apply_relu, x_ref, w_ref, b_ref, o_ref, acc_ref):
    @pl.when(pl.program_id(2) == 0)
    def _():
        acc_ref[...] = jnp.zeros_like(acc_ref)

    acc_ref[...] += jnp.dot(
        x_ref[...], w_ref[...], preferred_element_type=jnp.float32
    )

    @pl.when(pl.program_id(2) == pl.num_programs(2) - 1)
    def _():
        y = acc_ref[...] + b_ref[...]          # (1, tn) f32 broadcasts over rows
        if apply_relu:
            y = jnp.maximum(y, 0.0)            # f32 epilogue (v5e-safe), cast last
        o_ref[...] = y.astype(o_ref.dtype)


def pallas_linear(x, w_p, b_p, *, n_out, tk, tn, apply_relu=False):
    """y = [relu](x @ w_p + b_p)[:, :n_out].

    w_p: (Kp, Np) bf16, pre-transposed + pre-padded to tile multiples.
    b_p: (1, Np) f32, pre-padded (optional shift already folded in).
    Returns (B, n_out) bf16.
    """
    B, K = x.shape
    Kp, Np = w_p.shape
    assert K <= Kp and n_out <= Np

    # Batch tile: bf16 packs 16 sublanes/vreg; pad Mp to a tile multiple.
    tm = min(512, _round_up(B, 16))
    Mp = _round_up(B, tm)

    x_b = x.astype(jnp.bfloat16)
    if Mp != B or Kp != K:
        x_b = jnp.pad(x_b, ((0, Mp - B), (0, Kp - K)))

    out = pl.pallas_call(
        functools.partial(_linear_kernel, apply_relu),
        out_shape=jax.ShapeDtypeStruct((Mp, Np), jnp.bfloat16),
        grid_spec=pltpu.PrefetchScalarGridSpec(
            num_scalar_prefetch=0,
            grid=(Mp // tm, Np // tn, Kp // tk),
            in_specs=[
                pl.BlockSpec((tm, tk), lambda i, j, k: (i, k)),   # x tile
                pl.BlockSpec((tk, tn), lambda i, j, k: (k, j)),   # W tile (K, N)
                pl.BlockSpec((1, tn), lambda i, j, k: (0, j)),    # bias row
            ],
            out_specs=pl.BlockSpec((tm, tn), lambda i, j, k: (i, j)),
            scratch_shapes=[pltpu.VMEM((tm, tn), jnp.float32)],
        ),
        compiler_params=pltpu.CompilerParams(
            dimension_semantics=("parallel", "parallel", "arbitrary"),
            vmem_limit_bytes=64 * 1024 * 1024,
        ),
    )(x_b, w_p, b_p)

    if Mp != B or Np != n_out:
        out = out[:B, :n_out]
    return out


# ---------------------------------------------------------------------------
# Example layers (hot path runs in the Pallas kernel above)
# ---------------------------------------------------------------------------
class _PallasLinearBase:
    def __init__(self, weight, bias):
        # torch convention weight is (out, in); pre-transpose ONCE to (in, out),
        # cast to bf16 and pre-pad to tile-aligned (Kp, Np) at init so no
        # per-call pad/transpose of the largest operand appears in the graph.
        w_t = jnp.asarray(weight).T
        K, N = w_t.shape
        self.in_features = K
        self.out_features = N
        self.tk, self.tn, self.Kp, self.Np = _choose_nk_tiles(K, N)
        self.w_p = jnp.pad(
            w_t.astype(jnp.bfloat16), ((0, self.Kp - K), (0, self.Np - N)))
        self.b_p = jnp.pad(
            jnp.asarray(bias, dtype=jnp.float32), (0, self.Np - N)
        ).reshape(1, self.Np)


class PallasLinearReLU(_PallasLinearBase):
    """nn.Linear(in, out) + ReLU; no optional kwargs."""

    def forward(self, x):
        return pallas_linear(x, self.w_p, self.b_p, n_out=self.out_features,
                             tk=self.tk, tn=self.tn, apply_relu=True)


class PallasLinearWithShift(_PallasLinearBase):
    """nn.Linear(in, out) that accepts an optional additive `shift` kwarg."""

    def forward(self, x, shift=None):
        b_p = self.b_p
        if shift is not None:
            # Fold shift into the bias row: one tiny (1, Np) add in the wrapper,
            # no extra kernel input stream / VMEM buffer / epilogue add.
            s_p = jnp.pad(jnp.asarray(shift, dtype=jnp.float32),
                          (0, self.Np - self.out_features)).reshape(1, self.Np)
            b_p = b_p + s_p
        return pallas_linear(x, self.w_p, b_p, n_out=self.out_features,
                             tk=self.tk, tn=self.tn, apply_relu=False)


# ---------------------------------------------------------------------------
# OptionalSequential — same forward semantics as the PyTorch module:
# every layer sees the ORIGINAL positional args; optional kwargs go only to
# layers whose forward accepts them; the LAST layer's output is returned.
# ---------------------------------------------------------------------------
class OptionalSequential:

    def __init__(self, *layers):
        self.layers = list(layers)

    def forward(self, *args, **kwargs):
        opt_params = list(kwargs.keys())
        opt_inputs = list(kwargs.values())
        inputs = None
        for layer in self.layers:
            code = layer.forward.__code__
            # Only true parameters (not locals) — fixes the latent co_varnames
            # bug while keeping the intended kwarg routing.
            params = set(code.co_varnames[: code.co_argcount])
            opt_lparams = list(set(opt_params) & params)
            opt_linputs = [opt_inputs[opt_params.index(k)] for k in opt_lparams]
            opt = self.make_dict(opt_lparams, opt_linputs)
            if len(opt) == 0:
                inputs = layer.forward(*args)
            else:
                inputs = layer.forward(*args, **opt)
        return inputs

    def __call__(self, *args, **kwargs):
        return self.forward(*args, **kwargs)

    @staticmethod
    def make_dict(keys, values):
        temp_dict = dict()
        for k, v in zip(keys, values):
            temp_dict[k] = v
        return temp_dict


# ---------------------------------------------------------------------------
if __name__ == "__main__":
    B, H, O = 8, 32, 32   # small shapes: batch=8, hidden=32, out=32

    key = jax.random.PRNGKey(0)
    k_x, k_w1, k_b1, k_w2, k_b2, k_s = jax.random.split(key, 6)

    x = jax.random.normal(k_x, (B, H), dtype=jnp.float32)
    w1 = jax.random.normal(k_w1, (H, H), dtype=jnp.float32) * 0.1
    b1 = jax.random.normal(k_b1, (H,), dtype=jnp.float32) * 0.1
    w2 = jax.random.normal(k_w2, (O, H), dtype=jnp.float32) * 0.1
    b2 = jax.random.normal(k_b2, (O,), dtype=jnp.float32) * 0.1
    shift = jax.random.normal(k_s, (O,), dtype=jnp.float32)

    model = OptionalSequential(
        PallasLinearReLU(w1, b1),        # does not accept `shift`
        PallasLinearWithShift(w2, b2),   # accepts optional `shift`
    )

    # jit the container forward: the first layer's unused pallas_call is DCE'd,
    # so only the final (live) layer's kernel actually runs on-device.
    fwd = jax.jit(model.forward)
    out = jax.block_until_ready(fwd(x, shift=shift))

    # Pure-JAX f32 reference of the exact forward semantics:
    # args never chained -> result is last_layer(x, shift=shift).
    ref = x @ w2.T + b2.reshape(1, O) + shift.reshape(1, O)
    assert out.shape == (B, O)
    # bf16 MXU path -> relaxed tolerance vs f32 reference.
    assert jnp.allclose(out.astype(jnp.float32), ref, atol=3e-2, rtol=3e-2)

    # Also exercise the no-kwarg path (bias-only kernel, no shift fold).
    out2 = jax.block_until_ready(jax.jit(model.forward)(x))
    ref2 = x @ w2.T + b2.reshape(1, O)
    assert jnp.allclose(out2.astype(jnp.float32), ref2, atol=3e-2, rtol=3e-2)

    print("KERNEL_OK")
</pallas_src>

<mosaic_0001>
module attributes {stable_mosaic.version = 11 : i64} {
  func.func @_linear_kernel(%arg0: i32, %arg1: i32, %arg2: i32, %arg3: memref<16x128xbf16, #tpu.memory_space<vmem>>, %arg4: memref<128x128xbf16, #tpu.memory_space<vmem>>, %arg5: memref<1x128xf32, #tpu.memory_space<vmem>>, %arg6: memref<16x128xbf16, #tpu.memory_space<vmem>>, %arg7: memref<16x128xf32, #tpu.memory_space<vmem>>) attributes {dimension_semantics = [#tpu.dimension_semantics<parallel>, #tpu.dimension_semantics<parallel>, #tpu.dimension_semantics<arbitrary>], iteration_bounds = array<i64: 1, 1, 1>, scalar_prefetch = 0 : i64, scratch_operands = 1 : i64, tpu.core_type = #tpu.core_type<tc>, window_params = [{transform_indices = @transform_0, window_bounds = array<i64: 16, 128>}, {transform_indices = @transform_1, window_bounds = array<i64: 128, 128>}, {transform_indices = @transform_2, window_bounds = array<i64: 1, 128>}, {transform_indices = @transform_3, window_bounds = array<i64: 16, 128>}]} {
    %c0_i32 = arith.constant 0 : i32
    %0 = arith.cmpi eq, %arg2, %c0_i32 : i32
    %1 = arith.extui %0 : i1 to i32
    %c0_i32_0 = arith.constant 0 : i32
    %2 = arith.cmpi ne, %1, %c0_i32_0 : i32
    scf.if %2 {
      %cst_10 = arith.constant 0.000000e+00 : f32
      %12 = vector.broadcast %cst_10 : f32 to vector<16x128xf32>
      %c0_11 = arith.constant 0 : index
      %c0_12 = arith.constant 0 : index
      %13 = vector.load %arg7[%c0_11, %c0_12] : memref<16x128xf32, #tpu.memory_space<vmem>>, vector<16x128xf32>
      tpu.vector_store %arg7[%c0_11, %c0_12], %12 {strides = array<i32>} : memref<16x128xf32, #tpu.memory_space<vmem>>, vector<16x128xf32>,
    } else {
    }
    %c0 = arith.constant 0 : index
    %c0_1 = arith.constant 0 : index
    %3 = vector.load %arg7[%c0, %c0_1] : memref<16x128xf32, #tpu.memory_space<vmem>>, vector<16x128xf32>
    %c0_2 = arith.constant 0 : index
    %c0_3 = arith.constant 0 : index
    %4 = vector.load %arg3[%c0_2, %c0_3] : memref<16x128xbf16, #tpu.memory_space<vmem>>, vector<16x128xbf16>
    %c0_4 = arith.constant 0 : index
    %c0_5 = arith.constant 0 : index
    %5 = vector.load %arg4[%c0_4, %c0_5] : memref<128x128xbf16, #tpu.memory_space<vmem>>, vector<128x128xbf16>
    %cst = arith.constant dense<0.000000e+00> : vector<16x128xf32>
    %6 = tpu.matmul %4, %5, %cst {dimension_numbers = #tpu.dot_dimension_numbers<[1], [0], [0], [1], [0, 0, 1, 1], [], []>} : vector<16x128xbf16>, vector<128x128xbf16>, vector<16x128xf32> -> vector<16x128xf32>
    %7 = arith.addf %3, %6 : vector<16x128xf32>
    %c0_6 = arith.constant 0 : index
    %c0_7 = arith.constant 0 : index
    %8 = vector.load %arg7[%c0_6, %c0_7] : memref<16x128xf32, #tpu.memory_space<vmem>>, vector<16x128xf32>
    tpu.vector_store %arg7[%c0_6, %c0_7], %7 {strides = array<i32>} : memref<16x128xf32, #tpu.memory_space<vmem>>, vector<16x128xf32>,
    %c0_i32_8 = arith.constant 0 : i32
    %9 = arith.cmpi eq, %arg2, %c0_i32_8 : i32
    %10 = arith.extui %9 : i1 to i32
    %c0_i32_9 = arith.constant 0 : i32
    %11 = arith.cmpi ne, %10, %c0_i32_9 : i32
    scf.if %11 {
      %c0_10 = arith.constant 0 : index
      %c0_11 = arith.constant 0 : index
      %12 = vector.load %arg7[%c0_10, %c0_11] : memref<16x128xf32, #tpu.memory_space<vmem>>, vector<16x128xf32>
      %c0_12 = arith.constant 0 : index
      %c0_13 = arith.constant 0 : index
      %13 = vector.load %arg5[%c0_12, %c0_13] : memref<1x128xf32, #tpu.memory_space<vmem>>, vector<1x128xf32>
      %14 = vector.broadcast %13 : vector<1x128xf32> to vector<16x128xf32>
      %15 = arith.addf %12, %14 : vector<16x128xf32>
      %16 = arith.truncf %15 : vector<16x128xf32> to vector<16x128xbf16>
      %c0_14 = arith.constant 0 : index
      %c0_15 = arith.constant 0 : index
      %17 = vector.load %arg6[%c0_14, %c0_15] : memref<16x128xbf16, #tpu.memory_space<vmem>>, vector<16x128xbf16>
      tpu.vector_store %arg6[%c0_14, %c0_15], %16 {strides = array<i32>} : memref<16x128xbf16, #tpu.memory_space<vmem>>, vector<16x128xbf16>,
    } else {
    }
    return
  }
  func.func @transform_0(%arg0: i32, %arg1: i32, %arg2: i32) -> (i32, i32) {
    %c0_i32 = arith.constant 0 : i32
    return %arg0, %arg2 : i32, i32
  }
  func.func @transform_1(%arg0: i32, %arg1: i32, %arg2: i32) -> (i32, i32) {
    %c0_i32 = arith.constant 0 : i32
    return %arg2, %arg1 : i32, i32
  }
  func.func @transform_2(%arg0: i32, %arg1: i32, %arg2: i32) -> (i32, i32) {
    %c0_i32 = arith.constant 0 : i32
    %c0_i32_0 = arith.constant 0 : i32
    return %c0_i32, %arg1 : i32, i32
  }
  func.func @transform_3(%arg0: i32, %arg1: i32, %arg2: i32) -> (i32, i32) {
    %c0_i32 = arith.constant 0 : i32
    return %arg0, %arg1 : i32, i32
  }
}

</mosaic_0001>

<bundles_post_ra>
// kernel: forward.1
= control target key start
LH: loop header
LB: loop body
LE: loop exit
PB: predicated region body
PF: predicated region fallthrough
CT: control target
= control target key end

     0   :  { %8 = vsyncpa [#allocation4], 0  ;;  %s267_s12 = smov [#allocation3]   ;;  %s304_s0 = inlined_call_operand.vmem [shape: bf16[16,128], index: 0, kind: input, shape index: {}]   ;;  %s305_s1 = inlined_call_operand.hbm [shape: bf16[128,128], index: 1, kind: input, shape index: {}]   ;;  %s306_s2 = inlined_call_operand.vmem [shape: f32[1,128], index: 2, kind: input, shape index: {}]   ;;  %s307_s3 = inlined_call_operand.vmem [shape: bf16[16,128], index: 3, kind: output, shape index: {}]  }
   0x1   :  { %s16_s13 = sshll.u32 %s267_s12, 4  ;;  %s17_s13 = int_to_ptr.vmem [resolvable:$true] %s16_s13 }
   0x2   :  { %s253_s14 = scalar_lea.vmem %s17_s13, 1024  ;;  %p258_p1 = scmp.lt.s32.totalorder %s17_s13, %s17_s13 }
   0x3   :  { %p254_p0 = scmp.ne.s32.totalorder %s17_s13, %s253_s14  ;;  %p259_p2 = scmp.lt.s32.totalorder %s253_s14, %s253_s14 }
   0x5   :  { %p260_p3 = por %p259_p2, %p258_p1 }
   0x7   :  { %p261_p4 = pnand %p260_p3, %p254_p0 }
   0x9   :  { %264 = shalt.err (!%p261_p4)
}
   0xa   :  { %s268_s15 = smov 64   ;;  %s269_s16 = smov 4  }
   0xb   :  { %22 = dma.hbm_to_vmem [thread:$0]  %s305_s1, 1024, %s17_s13, [#allocation4], %s268_s15, %s268_s15, %s269_s16  }
   0xc   :  { %265 = dma.done.wait [#allocation4], 1024  }
   0xd   :  { %266 = vsyncadd [#allocation4], 4294966272  ;;  %v270_v0 = vmov 0.0   ;;  %vm271_vm0 = vmmov 0   ;;  %v236_v1 = vld [vmem:[#allocation3 + $0x38] sm:$0xff]   ;;  %v237_v2 = vld [vmem:[#allocation3 + $0x30] sm:$0xff]  }
   0xe   :  { %211 = vmatprep.subr.bf16.mxu0 %v270_v0  ;;  %227 = vmatprep.mubr.msk.bf16.mxu0 %vm271_vm0, %v270_v0  ;;  %v238_v3 = vld [vmem:[#allocation3 + $0x28] sm:$0xff]   ;;  %v239_v4 = vld [vmem:[#allocation3 + $0x20] sm:$0xff]   ;;  %v240_v5 = vld [vmem:[#allocation3 + $0x18] sm:$0xff]  }
   0xf   :  { %212 = vmatpush3.bf16.msra.mxu0 %v236_v1  ;;  %v241_v6 = vld [vmem:[#allocation3 + $0x10] sm:$0xff]   ;;  %v242_v7 = vld [vmem:[#allocation3 + $0x8] sm:$0xff]   ;;  %v243_v8 = vld [vmem:[#allocation3] sm:$0xff]  }
  0x10   :  { %213 = vmatprep.subr.bf16.mxu0 %v270_v0  ;;  %v244_v9 = vld [vmem:[%s304_s0] sm:$0xff]  }
  0x11   :  { %v192_v11 = vld [vmem:[%s306_s2] ss:$0 sm:$0xff] }
  0x13   :  { %214 = vmatpush3.bf16.msra.mxu0 %v237_v2 }
  0x14   :  { %215 = vmatprep.subr.bf16.mxu0 %v270_v0 }
  0x17   :  { %216 = vmatpush3.bf16.msra.mxu0 %v238_v3 }
  0x18   :  { %217 = vmatprep.subr.bf16.mxu0 %v270_v0 }
  0x1b   :  { %218 = vmatpush3.bf16.msra.mxu0 %v239_v4 }
  0x1c   :  { %219 = vmatprep.subr.bf16.mxu0 %v270_v0 }
  0x1f   :  { %220 = vmatpush3.bf16.msra.mxu0 %v240_v5 }
  0x20   :  { %221 = vmatprep.subr.bf16.mxu0 %v270_v0 }
  0x23   :  { %222 = vmatpush3.bf16.msra.mxu0 %v241_v6 }
  0x24   :  { %223 = vmatprep.subr.bf16.mxu0 %v270_v0 }
  0x27   :  { %224 = vmatpush3.bf16.msra.mxu0 %v242_v7 }
  0x28   :  { %225 = vmatprep.subr.bf16.mxu0 %v270_v0 }
  0x2b   :  { %226 = vmatpush3.bf16.msra.mxu0 %v243_v8 }
  0x2e   :  { %228 = vmatmul.mubr.bf16.vlgmr.msra.gmra.mxu0 %v244_v9 }
  0xee   :  { %v143_v10 = vpop.f32.mrf.mxu0 }
  0xef   :  { %v166_v14 = vadd.f32 %v192_v11, %v143_v10 }
  0xf0   :  { %v229_v12 = vpop.f32.mrf.mxu0 }
  0xf2   :  { %v146_v13 = vpop.f32.mrf.mxu0 }
  0xf3   :  { %v167_v15 = vadd.f32 %v192_v11, %v146_v13 }
  0xf4   :  { %v230_v16 = vpop.f32.mrf.mxu0 }
  0xf5   :  { %v200_v17 = vpack.c.bf16 %v167_v15, %v166_v14 }
  0xf7   :  { %201 = vst [vmem:[%s307_s3] sm:$0xff] %v200_v17  }
  0xf8   :  { %182 = vsyncpa [#allocation4], 1 }

</bundles_post_ra>
